<compile_context>
chip_gen: v6e
topology: v6e:2x2x1
jax: 0.10.0
libtpu: 0.0.40
codegen_flags: <defaults>
</compile_context>

<pallas_src>
import jax
import jax.numpy as jnp
from jax import lax
from jax.experimental import pallas as pl
from jax.experimental.pallas import tpu as pltpu

_LANE = 128
_SUBLANE = 8


def _make_bpr_kernel(cr, strip, chunks_per_core, rows_valid):
    """Kernel closure with trace-time constants baked in."""
    n_strips = cr // strip

    def kernel(gamma_ref, pos_ref, neg_ref, out_ref):
        k = pl.program_id(1)

        @pl.when(k == 0)
        def _init():
            out_ref[...] = jnp.zeros_like(out_ref)

        # Unclamped first row of this block. The input index_map clamps the
        # DMA for grid-overshoot blocks (they re-read valid data); this row
        # mask zeroes their contribution, and also masks the ragged tail rows
        # of the last real block.
        row0 = (pl.program_id(0) * chunks_per_core + k) * cr

        gamma = gamma_ref[0]
        row_iota = lax.broadcasted_iota(jnp.int32, (strip, _LANE), 0)  # hoisted

        def strip_body(s, acc):
            r0 = s * strip  # static under full unroll
            d = (pos_ref[pl.ds(r0, strip), :].astype(jnp.float32)
                 - neg_ref[pl.ds(r0, strip), :].astype(jnp.float32))
            # sigmoid via tanh: tanh + log = 2 EUP ops/elem (vs exp+recip+log).
            sig = 0.5 * jnp.tanh(0.5 * d) + 0.5
            val = jnp.log(gamma + sig)                       # +log; negate outside
            valid = row_iota < (rows_valid - row0 - r0)      # row-level mask
            val = jnp.where(valid, val, 0.0)
            # Cross-vreg partial sums into a lane/sublane-dense (8,128) acc;
            # the single expensive cross-lane reduce happens once outside.
            return acc + jnp.sum(val.reshape(-1, _SUBLANE, _LANE), axis=0)

        acc = lax.fori_loop(0, n_strips, strip_body,
                            jnp.zeros((_SUBLANE, _LANE), jnp.float32),
                            unroll=True)
        out_ref[...] += acc

    return kernel


def bpr_loss(pos_score, neg_score, gamma=1e-10, *, chunk_rows=2048,
             num_parallel=2, strip_rows=256):
    """Pallas TPU implementation of BPRLoss.forward.

    pos_score, neg_score: shape (N,), same dtype (f32 or bf16 — kept in native
    dtype through HBM, cast to f32 in-kernel). Returns a float32 scalar.
    """
    assert pos_score.shape == neg_score.shape
    assert pos_score.ndim == 1
    assert num_parallel >= 1
    assert strip_rows % _SUBLANE == 0 and chunk_rows % strip_rows == 0
    n = pos_score.shape[0]

    rows = n // _LANE            # fully-populated 128-wide rows
    n_main = rows * _LANE
    tail = n - n_main            # < 128 leftover elements (plain-JAX path)

    total = jnp.float32(0.0)
    gamma_f = jnp.float32(gamma)

    if rows > 0:
        # 128-aligned prefix viewed as (rows, 128): a pure bitcast when n is a
        # multiple of 128, otherwise a contiguous prefix slice (no pad blow-up).
        if tail:
            pos_m = pos_score[:n_main].reshape(rows, _LANE)
            neg_m = neg_score[:n_main].reshape(rows, _LANE)
        else:
            pos_m = pos_score.reshape(rows, _LANE)
            neg_m = neg_score.reshape(rows, _LANE)

        cr = min(chunk_rows, pl.cdiv(rows, strip_rows) * strip_rows)
        num_blocks = pl.cdiv(rows, cr)
        np_eff = max(1, min(num_parallel, num_blocks))
        chunks_per_core = pl.cdiv(num_blocks, np_eff)
        last_block = num_blocks - 1

        def in_map(p, k):
            b = p * chunks_per_core + k
            return (jnp.minimum(b, last_block), 0)   # clamp overshoot blocks

        kernel = _make_bpr_kernel(cr, strip_rows, chunks_per_core, rows)

        partials = pl.pallas_call(
            kernel,
            out_shape=jax.ShapeDtypeStruct((np_eff * _SUBLANE, _LANE),
                                           jnp.float32),
            grid=(np_eff, chunks_per_core),
            in_specs=[
                pl.BlockSpec(memory_space=pltpu.MemorySpace.SMEM),   # gamma
                pl.BlockSpec((cr, _LANE), in_map),
                pl.BlockSpec((cr, _LANE), in_map),
            ],
            out_specs=pl.BlockSpec((_SUBLANE, _LANE), lambda p, k: (p, 0)),
            compiler_params=pltpu.CompilerParams(
                dimension_semantics=("parallel", "arbitrary")),
        )(jnp.asarray([gamma], dtype=jnp.float32), pos_m, neg_m)

        total = total + jnp.sum(partials)

    if tail:
        pt = pos_score[n_main:].astype(jnp.float32)
        nt = neg_score[n_main:].astype(jnp.float32)
        total = total + jnp.sum(jnp.log(gamma_f + jax.nn.sigmoid(pt - nt)))

    # Single negate + mean over the true element count.
    return -total / jnp.float32(n)


if __name__ == "__main__":
    key = jax.random.PRNGKey(0)
    k1, k2 = jax.random.split(key)

    # Small primary case: N = 2048 (16 rows of 128) — exercises the kernel path
    # with a partial (masked) block.
    N = 2048
    pos_score = jax.random.normal(k1, (N,), dtype=jnp.float32)
    neg_score = jax.random.normal(k2, (N,), dtype=jnp.float32)
    loss = jax.jit(bpr_loss)(pos_score, neg_score)
    jax.block_until_ready(loss)
    ref = -jnp.mean(jnp.log(1e-10 + jax.nn.sigmoid(pos_score - neg_score)))
    assert jnp.allclose(loss, ref, atol=1e-5, rtol=1e-5), (loss, ref)

    # Larger non-128-aligned case: multi-block reduction + ragged-row mask +
    # sub-128 tail + both "parallel" grid slots.
    N2 = 300_000
    k3, k4 = jax.random.split(k2)
    p2 = jax.random.normal(k3, (N2,), dtype=jnp.float32)
    n2 = jax.random.normal(k4, (N2,), dtype=jnp.float32)
    loss2 = jax.jit(bpr_loss)(p2, n2)
    jax.block_until_ready(loss2)
    ref2 = -jnp.mean(jnp.log(1e-10 + jax.nn.sigmoid(p2 - n2)))
    assert jnp.allclose(loss2, ref2, atol=1e-5, rtol=1e-5), (loss2, ref2)

    # bf16 inputs stay bf16 through HBM; kernel casts per block.
    p2b = p2.astype(jnp.bfloat16)
    n2b = n2.astype(jnp.bfloat16)
    loss3 = jax.jit(bpr_loss)(p2b, n2b)
    jax.block_until_ready(loss3)
    ref3 = -jnp.mean(jnp.log(1e-10 + jax.nn.sigmoid(
        p2b.astype(jnp.float32) - n2b.astype(jnp.float32))))
    assert jnp.allclose(loss3, ref3, atol=1e-5, rtol=1e-5), (loss3, ref3)

    print("KERNEL_OK")
</pallas_src>

<mosaic_0001>
module attributes {stable_mosaic.version = 11 : i64} {
  func.func @kernel(%arg0: i32, %arg1: i32, %arg2: memref<1xf32, #tpu.memory_space<smem>>, %arg3: memref<256x128xf32, #tpu.memory_space<vmem>>, %arg4: memref<256x128xf32, #tpu.memory_space<vmem>>, %arg5: memref<8x128xf32, #tpu.memory_space<vmem>>) attributes {dimension_semantics = [#tpu.dimension_semantics<parallel>, #tpu.dimension_semantics<arbitrary>], iteration_bounds = array<i64: 1, 1>, scalar_prefetch = 0 : i64, scratch_operands = 0 : i64, tpu.core_type = #tpu.core_type<tc>, window_params = [{transform_indices = @transform_0, window_bounds = array<i64: 1>}, {transform_indices = @transform_1, window_bounds = array<i64: 256, 128>}, {transform_indices = @transform_2, window_bounds = array<i64: 256, 128>}, {transform_indices = @transform_3, window_bounds = array<i64: 8, 128>}]} {
    %c0_i32 = arith.constant 0 : i32
    %0 = arith.cmpi eq, %arg1, %c0_i32 : i32
    %1 = arith.extui %0 : i1 to i32
    %c0_i32_0 = arith.constant 0 : i32
    %2 = arith.cmpi ne, %1, %c0_i32_0 : i32
    scf.if %2 {
      %cst_15 = arith.constant 0.000000e+00 : f32
      %37 = vector.broadcast %cst_15 : f32 to vector<8x128xf32>
      %c0_16 = arith.constant 0 : index
      %c0_17 = arith.constant 0 : index
      %38 = vector.load %arg5[%c0_16, %c0_17] : memref<8x128xf32, #tpu.memory_space<vmem>>, vector<8x128xf32>
      tpu.vector_store %arg5[%c0_16, %c0_17], %37 {strides = array<i32>} : memref<8x128xf32, #tpu.memory_space<vmem>>, vector<8x128xf32>,
    } else {
    }
    %c1_i32 = arith.constant 1 : i32
    %3 = arith.muli %arg0, %c1_i32 : i32
    %4 = arith.addi %3, %arg1 : i32
    %c256_i32 = arith.constant 256 : i32
    %5 = arith.muli %4, %c256_i32 : i32
    %c0 = arith.constant 0 : index
    %6 = memref.load %arg2[%c0] : memref<1xf32, #tpu.memory_space<smem>>
    %7 = tpu.iota {dimensions = array<i32: 0>} : vector<256x128xi32>
    %cst = arith.constant 0.000000e+00 : f32
    %8 = vector.broadcast %cst : f32 to vector<8x128xf32>
    %c0_i32_1 = arith.constant 0 : i32
    %c256_i32_2 = arith.constant 256 : i32
    %9 = arith.muli %c0_i32_1, %c256_i32_2 : i32
    %10 = arith.index_cast %9 : i32 to index
    %c0_3 = arith.constant 0 : index
    %11 = vector.load %arg3[%10, %c0_3] : memref<256x128xf32, #tpu.memory_space<vmem>>, vector<256x128xf32>
    %12 = arith.index_cast %9 : i32 to index
    %c0_4 = arith.constant 0 : index
    %13 = vector.load %arg4[%12, %c0_4] : memref<256x128xf32, #tpu.memory_space<vmem>>, vector<256x128xf32>
    %14 = arith.subf %11, %13 : vector<256x128xf32>
    %cst_5 = arith.constant 5.000000e-01 : f32
    %15 = vector.broadcast %cst_5 : f32 to vector<256x128xf32>
    %16 = arith.mulf %15, %14 : vector<256x128xf32>
    %17 = math.tanh %16 : vector<256x128xf32>
    %cst_6 = arith.constant 5.000000e-01 : f32
    %18 = vector.broadcast %cst_6 : f32 to vector<256x128xf32>
    %19 = arith.mulf %18, %17 : vector<256x128xf32>
    %cst_7 = arith.constant 5.000000e-01 : f32
    %20 = vector.broadcast %cst_7 : f32 to vector<256x128xf32>
    %21 = arith.addf %19, %20 : vector<256x128xf32>
    %22 = vector.broadcast %6 : f32 to vector<256x128xf32>
    %23 = arith.addf %22, %21 : vector<256x128xf32>
    %24 = math.log %23 : vector<256x128xf32>
    %c16_i32 = arith.constant 16 : i32
    %25 = arith.subi %c16_i32, %5 : i32
    %26 = arith.subi %25, %9 : i32
    %27 = vector.broadcast %26 : i32 to vector<256x128xi32>
    %28 = arith.cmpi slt, %7, %27 : vector<256x128xi32>
    %cst_8 = arith.constant 0.000000e+00 : f32
    %29 = vector.broadcast %cst_8 : f32 to vector<256x128xf32>
    %30 = arith.select %28, %24, %29 : vector<256x128xi1>, vector<256x128xf32>
    %31 = vector.shape_cast %30 : vector<256x128xf32> to vector<32x8x128xf32>
    %cst_9 = arith.constant dense<0.000000e+00> : vector<8x128xf32>
    %32 = vector.multi_reduction <add>, %31, %cst_9 [0] : vector<32x8x128xf32> to vector<8x128xf32>
    %33 = arith.addf %8, %32 : vector<8x128xf32>
    %c1_i32_10 = arith.constant 1 : i32
    %c0_11 = arith.constant 0 : index
    %c0_12 = arith.constant 0 : index
    %34 = vector.load %arg5[%c0_11, %c0_12] : memref<8x128xf32, #tpu.memory_space<vmem>>, vector<8x128xf32>
    %35 = arith.addf %34, %33 : vector<8x128xf32>
    %c0_13 = arith.constant 0 : index
    %c0_14 = arith.constant 0 : index
    %36 = vector.load %arg5[%c0_13, %c0_14] : memref<8x128xf32, #tpu.memory_space<vmem>>, vector<8x128xf32>
    tpu.vector_store %arg5[%c0_13, %c0_14], %35 {strides = array<i32>} : memref<8x128xf32, #tpu.memory_space<vmem>>, vector<8x128xf32>,
    return
  }
  func.func @transform_0(%arg0: i32, %arg1: i32) -> i32 {
    %c0_i32 = arith.constant 0 : i32
    %c0_i32_0 = arith.constant 0 : i32
    return %c0_i32 : i32
  }
  func.func @transform_1(%arg0: i32, %arg1: i32) -> (i32, i32) {
    %c1_i32 = arith.constant 1 : i32
    %0 = arith.muli %arg0, %c1_i32 : i32
    %1 = arith.addi %0, %arg1 : i32
    %c0_i32 = arith.constant 0 : i32
    %2 = arith.minsi %1, %c0_i32 : i32
    %c0_i32_0 = arith.constant 0 : i32
    %c0_i32_1 = arith.constant 0 : i32
    return %2, %c0_i32_0 : i32, i32
  }
  func.func @transform_2(%arg0: i32, %arg1: i32) -> (i32, i32) {
    %c1_i32 = arith.constant 1 : i32
    %0 = arith.muli %arg0, %c1_i32 : i32
    %1 = arith.addi %0, %arg1 : i32
    %c0_i32 = arith.constant 0 : i32
    %2 = arith.minsi %1, %c0_i32 : i32
    %c0_i32_0 = arith.constant 0 : i32
    %c0_i32_1 = arith.constant 0 : i32
    return %2, %c0_i32_0 : i32, i32
  }
  func.func @transform_3(%arg0: i32, %arg1: i32) -> (i32, i32) {
    %c0_i32 = arith.constant 0 : i32
    %c0_i32_0 = arith.constant 0 : i32
    return %arg0, %c0_i32 : i32, i32
  }
}

</mosaic_0001>

<bundles_post_ra>
// kernel: bpr_loss.1
= control target key start
LH: loop header
LB: loop body
LE: loop exit
PB: predicated region body
PF: predicated region fallthrough
CT: control target
= control target key end

     0   :  { %9 = vsyncpa [#allocation4], 0  ;;  %s641_s0 = inlined_call_operand.<no memory space> [shape: f32[1], index: 0, kind: input, shape index: {}]   ;;  %s642_s1 = inlined_call_operand.hbm [shape: f32[16,128], index: 1, kind: input, shape index: {}]   ;;  %s643_s2 = inlined_call_operand.hbm [shape: f32[16,128], index: 2, kind: input, shape index: {}]   ;;  %s644_s3 = inlined_call_operand.vmem [shape: f32[8,128], index: 3, kind: output, shape index: {}]  }
   0x1   :  { %10 = vsyncpa [#allocation6], 0 }
   0x2   :  { %23 = vsyncadd [#allocation4], 3840  ;;  %s605_s12 = smov [#allocation3]  }
   0x3   :  { %s28_s13 = sshll.u32 %s605_s12, 4  ;;  %s29_s13 = int_to_ptr.vmem [resolvable:$true] %s28_s13 }
   0x4   :  { %s569_s14 = scalar_lea.vmem %s29_s13, 256  ;;  %s573_s15 = scalar_lea.vmem %s29_s13, 4096 }
   0x5   :  { %p570_p0 = scmp.ne.s32.totalorder %s29_s13, %s569_s14  ;;  %p574_p1 = scmp.lt.s32.totalorder %s29_s13, %s29_s13 }
   0x6   :  { %p575_p2 = scmp.lt.s32.totalorder %s573_s15, %s569_s14 }
   0x8   :  { %p576_p3 = por %p575_p2, %p574_p1 }
   0xa   :  { %p577_p4 = pnand %p576_p3, %p570_p0 }
   0xc   :  { %580 = shalt.err (!%p577_p4)
}
   0xd   :  { %s606_s16 = smov 128   ;;  %s607_s17 = smov 8  }
   0xe   :  { %34 = dma.hbm_to_vmem [thread:$0]  %s642_s1, 256, %s29_s13, [#allocation4], %s606_s16, %s606_s16, %s607_s17  }
   0xf   :  { %45 = vsyncadd [#allocation6], 3840  ;;  %s608_s20 = smov [#allocation5]  }
  0x10   :  { %s50_s21 = sshll.u32 %s608_s20, 4  ;;  %s51_s21 = int_to_ptr.vmem [resolvable:$true] %s50_s21 }
  0x11   :  { %s589_s22 = scalar_lea.vmem %s51_s21, 256  ;;  %s593_s23 = scalar_lea.vmem %s51_s21, 4096 }
  0x12   :  { %p590_p5 = scmp.ne.s32.totalorder %s51_s21, %s589_s22  ;;  %p594_p6 = scmp.lt.s32.totalorder %s51_s21, %s51_s21 }
  0x13   :  { %p595_p7 = scmp.lt.s32.totalorder %s593_s23, %s589_s22 }
  0x15   :  { %p596_p8 = por %p595_p7, %p594_p6 }
  0x17   :  { %p597_p9 = pnand %p596_p8, %p590_p5 }
  0x19   :  { %600 = shalt.err (!%p597_p9)
}
  0x1a   :  { %56 = dma.hbm_to_vmem [thread:$0]  %s643_s2, 256, %s51_s21, [#allocation6], %s606_s16, %s606_s16, %s607_s17  }
  0x1b   :  { %601 = dma.done.wait [#allocation4], 4096  }
  0x1c   :  { %602 = vsyncadd [#allocation4], 4294963200 }
  0x1d   :  { %603 = dma.done.wait [#allocation6], 4096  }
  0x1e   :  { %604 = vsyncadd [#allocation6], 4294963200  ;;  %v116_v0 = vld [vmem:[#allocation3] sm:$0xff]  ;;  %v117_v1 = vld [vmem:[#allocation3 + $0x8] sm:$0xff]  ;;  %v340_v12 = vstv %s641_s0 }
  0x1f   :  { %v148_v2 = vld [vmem:[#allocation5] sm:$0xff]  ;;  %v149_v3 = vld [vmem:[#allocation5 + $0x8] sm:$0xff] }
  0x20   :  { %v180_v4 = vsub.f32 %v116_v0, %v148_v2  ;;  %v181_v5 = vsub.f32 %v117_v1, %v149_v3 }
  0x22   :  { %v212_v6 = vmul.f32 0.5, %v180_v4  ;;  %v213_v7 = vmul.f32 0.5, %v181_v5 }
  0x24   :  { %553 = vtanh.f32 %v212_v6 }
  0x25   :  { %555 = vtanh.f32 %v213_v7 }
  0x31   :  { %v554_v8 = vpop.eup %553 }
  0x32   :  { %v556_v9 = vpop.eup %555  ;;  %v276_v10 = vmul.f32 0.5, %v554_v8 }
  0x33   :  { %v277_v11 = vmul.f32 0.5, %v556_v9 }
  0x34   :  { %v308_v13 = vadd.f32 0.5, %v276_v10 }
  0x35   :  { %v309_v14 = vadd.f32 0.5, %v277_v11 }
  0x36   :  { %v341_v15 = vadd.f32 %v340_v12, %v308_v13 }
  0x37   :  { %v342_v16 = vadd.f32 %v340_v12, %v309_v14 }
  0x38   :  { %557 = vlog2.f32 %v341_v15 }
  0x39   :  { %559 = vlog2.f32 %v342_v16 }
  0x45   :  { %v558_v17 = vpop.eup %557 }
  0x46   :  { %v560_v18 = vpop.eup %559  ;;  %v374_v19 = vmul.f32 0.6931472, %v558_v17 }
  0x47   :  { %v376_v20 = vmul.f32 0.6931472, %v560_v18 }
  0x49   :  { %v503_v21 = vadd.f32 %v376_v20, %v374_v19 }
  0x4b   :  { %537 = vst [vmem:[%s644_s3] sm:$0xff] %v503_v21 }
  0x4c   :  { %542 = vsyncpa [#allocation4], 1 }
  0x4d   :  { %543 = vsyncpa [#allocation6], 1 }

</bundles_post_ra>
